<compile_context>
chip_gen: v5e
topology: v5e:2x2
jax: 0.10.0
libtpu: 0.0.40
codegen_flags: <defaults>
</compile_context>

<pallas_src>
import jax
import jax.numpy as jnp
import numpy as np
from jax.experimental import pallas as pl
from jax.experimental.pallas import tpu as pltpu


def _ht_matmul_kernel(x_ref, w_ref, o_ref):
    # x_ref: VMEM (TB, K)  batch tile of flattened input, native dtype
    # w_ref: VMEM (K, N)   merged subtree weight (bf16); constant block index -> stays resident
    # o_ref: VMEM (TB, N)  lane-dense output slab (N multiple of 128)
    x_bf16 = x_ref[...].astype(jnp.bfloat16)          # in-VMEM VPU cast, no extra HBM pass
    acc = jnp.dot(x_bf16, w_ref[...], preferred_element_type=jnp.float32)
    o_ref[...] = acc.astype(o_ref.dtype)


def _select_batch_tile(batch: int, block_b: int) -> int:
    """Pick a batch tile that is always a legal BlockSpec dim and memory-roofline friendly."""
    if batch <= block_b:
        # Single grid step; block == full batch dim, which is legal for any size
        # (no padding, no extra grid-step overhead for tiny batches).
        return batch
    tb = max(8, (block_b // 8) * 8)          # keep sublane (8) alignment
    # For very large batches prefer >= 8 grid steps (so v7x's two TensorCores each get
    # several steps to pipeline), but never shrink below 1024 rows per step so the
    # ~0.35 us per-step overhead stays <10% of the per-step DMA time.
    while batch // tb < 8 and tb >= 2048:
        tb //= 2
    return tb


def ht_subtree_forward(x, f0, core, f1, *, block_b: int = 4096, out_dtype=None):
    """x: (B, I0, I1); f0: (I0, O0, R); core: (R, R, R); f1: (I1, O1, R) -> (B, R, O0, O1)."""
    B, I0, I1 = x.shape
    O0, R = f0.shape[1], f0.shape[2]
    O1 = f1.shape[1]
    K = I0 * I1
    N = R * O0 * O1
    out_dtype = x.dtype if out_dtype is None else out_dtype

    # --- glue: merge the subtree parameters once (batch-independent, tiny: K*N*2 bytes) ----
    # W[i0, i1, p, o0, o1] = sum_{r0, r1} F0[i0,o0,r0] * C[r0,r1,p] * F1[i1,o1,r1]
    # TODO(synk): if the factors are static across calls, hoist this einsum out of the
    # per-call path (it is a per-call XLA op otherwise; cheap but not free).
    w = jnp.einsum(
        "iok,klp,jql->ijpoq",
        f0.astype(jnp.float32), core.astype(jnp.float32), f1.astype(jnp.float32),
    ).reshape(K, N).astype(jnp.bfloat16)

    # Free reshape (contiguous); no dtype cast -> no extra HBM pass in the wrapper.
    x2 = x.reshape(B, K)

    tb = _select_batch_tile(B, block_b)
    grid = (pl.cdiv(B, tb),)

    x_bytes = int(jnp.dtype(x2.dtype).itemsize)
    o_bytes = int(jnp.dtype(out_dtype).itemsize)

    out = pl.pallas_call(
        _ht_matmul_kernel,
        out_shape=jax.ShapeDtypeStruct((B, N), out_dtype),
        grid_spec=pltpu.PrefetchScalarGridSpec(
            num_scalar_prefetch=0,
            grid=grid,
            in_specs=[
                pl.BlockSpec((tb, K), lambda b: (b, 0)),   # batch tile of X (partial last block OK)
                pl.BlockSpec((K, N), lambda b: (0, 0)),    # W: constant block -> stays resident
            ],
            out_specs=pl.BlockSpec((tb, N), lambda b: (b, 0)),  # lane-dense (N = 256) output slab
        ),
        compiler_params=pltpu.CompilerParams(
            dimension_semantics=("parallel",),
        ),
        cost_estimate=pl.CostEstimate(
            flops=2 * B * K * N,
            transcendentals=0,
            bytes_accessed=x_bytes * B * K + 2 * K * N + o_bytes * B * N,
        ),
    )(x2, w)

    # restore the documented (B, R, O0, O1) layout (free reshape)
    return out.reshape(B, R, O0, O1)


def _xavier_normal(key, shape, in_axes, out_axes):
    # deterministic analog of the module's custom xavier_normal(tensor, in_axes, out_axes)
    fan_in = int(np.prod([shape[a] for a in in_axes]))
    fan_out = int(np.prod([shape[a] for a in out_axes]))
    std = float(np.sqrt(2.0 / (fan_in + fan_out)))
    return std * jax.random.normal(key, shape, dtype=jnp.float32)


if __name__ == "__main__":
    # HTSubTree(is_left_child=False, interval=(0, 2),
    #           input_shape=(8, 8), output_shape=(8, 8), rank=4)
    B, I0, I1, O0, O1, R = 2, 8, 8, 8, 8, 4

    key = jax.random.PRNGKey(0)
    k_x, k_f0, k_c, k_f1, k_x2 = jax.random.split(key, 5)

    # leaf factors: xavier_normal(root, [0], [1, 2])
    f0 = _xavier_normal(k_f0, (I0, O0, R), in_axes=[0], out_axes=[1, 2])
    f1 = _xavier_normal(k_f1, (I1, O1, R), in_axes=[0], out_axes=[1, 2])
    # root core (right-child init rule): xavier_normal(root, [0, 2], [1])
    core = _xavier_normal(k_c, (R, R, R), in_axes=[0, 2], out_axes=[1])

    def reference(xx):
        return jnp.einsum("bij,iok,klp,jql->bpoq", xx, f0, core, f1)

    # --- small batch (module's nominal use): single grid step, no padding ----------------
    x = jax.random.normal(k_x, (B, I0, I1), dtype=jnp.float32)
    y = jax.block_until_ready(ht_subtree_forward(x, f0, core, f1))
    assert y.shape == (B, R, O0, O1)
    # bf16 MXU operands with f32 accumulation: slightly looser numerics than pure f32.
    assert jnp.allclose(y, reference(x), rtol=1e-2, atol=1e-2), "mismatch vs reference (B=2)"

    # --- non-multiple batch with a small tile: exercises the multi-step grid and the
    #     partial last block (no wrapper-side pad/slice) ----------------------------------
    B2 = 33
    x_big = jax.random.normal(k_x2, (B2, I0, I1), dtype=jnp.float32)
    y_big = jax.block_until_ready(ht_subtree_forward(x_big, f0, core, f1, block_b=16))
    assert y_big.shape == (B2, R, O0, O1)
    assert jnp.allclose(y_big, reference(x_big), rtol=1e-2, atol=1e-2), "mismatch vs reference (B=33)"

    print("KERNEL_OK")
</pallas_src>

<mosaic_0001>
module attributes {stable_mosaic.version = 11 : i64} {
  func.func @_ht_matmul_kernel(%arg0: i32, %arg1: memref<2x64xf32, #tpu.memory_space<vmem>>, %arg2: memref<64x256xbf16, #tpu.memory_space<vmem>>, %arg3: memref<2x256xf32, #tpu.memory_space<vmem>>) attributes {dimension_semantics = [#tpu.dimension_semantics<parallel>], iteration_bounds = array<i64: 1>, scalar_prefetch = 0 : i64, scratch_operands = 0 : i64, tpu.core_type = #tpu.core_type<tc>, window_params = [{transform_indices = @transform_0, window_bounds = array<i64: 2, 64>}, {pipeline_mode = #tpu.pipeline_mode<synchronous>, transform_indices = @transform_1, window_bounds = array<i64: 64, 256>}, {transform_indices = @transform_2, window_bounds = array<i64: 2, 256>}]} {
    %c0 = arith.constant 0 : index
    %c0_0 = arith.constant 0 : index
    %0 = vector.load %arg1[%c0, %c0_0] : memref<2x64xf32, #tpu.memory_space<vmem>>, vector<2x64xf32>
    %1 = arith.truncf %0 : vector<2x64xf32> to vector<2x64xbf16>
    %c0_1 = arith.constant 0 : index
    %c0_2 = arith.constant 0 : index
    %2 = vector.load %arg2[%c0_1, %c0_2] : memref<64x256xbf16, #tpu.memory_space<vmem>>, vector<64x256xbf16>
    %cst = arith.constant dense<0.000000e+00> : vector<2x256xf32>
    %3 = tpu.matmul %1, %2, %cst {dimension_numbers = #tpu.dot_dimension_numbers<[1], [0], [0], [1], [0, 0, 1, 1], [], []>} : vector<2x64xbf16>, vector<64x256xbf16>, vector<2x256xf32> -> vector<2x256xf32>
    %c0_3 = arith.constant 0 : index
    %c0_4 = arith.constant 0 : index
    %4 = vector.load %arg3[%c0_3, %c0_4] : memref<2x256xf32, #tpu.memory_space<vmem>>, vector<2x256xf32>
    tpu.vector_store %arg3[%c0_3, %c0_4], %3 {strides = array<i32>} : memref<2x256xf32, #tpu.memory_space<vmem>>, vector<2x256xf32>,
    return
  }
  func.func @transform_0(%arg0: i32) -> (i32, i32) {
    %c0_i32 = arith.constant 0 : i32
    %c0_i32_0 = arith.constant 0 : i32
    return %arg0, %c0_i32 : i32, i32
  }
  func.func @transform_1(%arg0: i32) -> (i32, i32) {
    %c0_i32 = arith.constant 0 : i32
    %c0_i32_0 = arith.constant 0 : i32
    %c0_i32_1 = arith.constant 0 : i32
    return %c0_i32, %c0_i32_0 : i32, i32
  }
  func.func @transform_2(%arg0: i32) -> (i32, i32) {
    %c0_i32 = arith.constant 0 : i32
    %c0_i32_0 = arith.constant 0 : i32
    return %arg0, %c0_i32 : i32, i32
  }
}

</mosaic_0001>

<bundles_post_ra>
// kernel: tpu_custom_call.1
= control target key start
LH: loop header
LB: loop body
LE: loop exit
PB: predicated region body
PF: predicated region fallthrough
CT: control target
= control target key end

     0   :  { %7 = vsyncpa [#allocation3], 0  ;;  %s302_s0 = inlined_call_operand.hbm [shape: f32[2,64], index: 0, kind: input, shape index: {}]   ;;  %s303_s1 = inlined_call_operand.hbm [shape: bf16[64,256], index: 1, kind: input, shape index: {}]   ;;  %s304_s2 = inlined_call_operand.hbm [shape: f32[2,256], index: 2, kind: output, shape index: {}]  }
   0x1   :  { %8 = vsyncpa [#allocation6], 0 }
   0x2   :  { %9 = vsyncpa [#allocation4], 0  ;;  %s15_s11 = sshll.u32 %s302_s0, 4  ;;  %s273_s12 = smov [#allocation2]   ;;  %s16_s11 = int_to_ptr.hbm [resolvable:$true] %s15_s11 }
   0x3   :  { %s17_s13 = sshll.u32 %s273_s12, 4  ;;  %s25_s16 = sshll.u32 %s303_s1, 4  ;;  %s18_s13 = int_to_ptr.vmem [resolvable:$true] %s17_s13  ;;  %s26_s16 = int_to_ptr.hbm [resolvable:$true] %s25_s16 }
   0x4   :  { %20 = dma.hbm_to_vmem [thread:$0]  %s16_s11, 32, %s18_s13, [#allocation3]  }
   0x5   :  { %s274_s17 = smov [#allocation5]   ;;  %s275_s19 = smov 128  }
   0x6   :  { %s27_s18 = sshll.u32 %s274_s17, 4  ;;  %s276_s20 = smov 8   ;;  %s28_s18 = int_to_ptr.vmem [resolvable:$true] %s27_s18 }
   0x7   :  { %33 = dma.hbm_to_vmem [thread:$0]  %s26_s16, 1024, %s28_s18, [#allocation6], %s275_s19, %s275_s19, %s276_s20  }
   0x8   :  { %267 = dma.done.wait [#allocation3], 32  }
   0x9   :  { %268 = vsyncadd [#allocation3], 4294967264 }
   0xa   :  { %269 = dma.done.wait [#allocation6], 1024  }
   0xb   :  { %270 = vsyncadd [#allocation6], 4294966272  ;;  %v174_v0 = vld [vmem:[#allocation5 + $0x30] sm:$0xf]  ;;  %v189_v1 = vld [vmem:[#allocation5 + $0x34] sm:$0xf0] }
   0xc   :  { %v188_v2 = vld [vmem:[#allocation5 + $0x34] sm:$0xf]  ;;  %v175_v3 = vor.u32 %v189_v1, %v174_v0  ;;  %v176_v4 = vld [vmem:[#allocation5 + $0x38] sm:$0xf0]  ;;  %v166_v5 = vld [vmem:[#allocation5 + $0x20] sm:$0xf] }
   0xd   :  { %v187_v6 = vld [vmem:[#allocation5 + $0x24] sm:$0xf0]  ;;  %v179_v7 = vor.u32 %v188_v2, %v176_v4  ;;  %v186_v8 = vld [vmem:[#allocation5 + $0x24] sm:$0xf]  ;;  %v168_v9 = vld [vmem:[#allocation5 + $0x28] sm:$0xf0] }
   0xe   :  { %101 = vmatpush.bf16.msra.mxu0 %v175_v3  ;;  %v167_v10 = vor.u32 %v187_v6, %v166_v5  ;;  %v171_v11 = vor.u32 %v186_v8, %v168_v9  ;;  %v158_v12 = vld [vmem:[#allocation5 + $0x10] sm:$0xf]  ;;  %v185_v13 = vld [vmem:[#allocation5 + $0x14] sm:$0xf0]  ;;  %v184_v14 = vld [vmem:[#allocation5 + $0x14] sm:$0xf] }
   0xf   :  { %114 = vmatpush.bf16.msra.mxu1 %v179_v7  ;;  %v160_v15 = vld [vmem:[#allocation5 + $0x18] sm:$0xf0]  ;;  %v159_v16 = vor.u32 %v185_v13, %v158_v12  ;;  %v150_v18 = vld [vmem:[#allocation5] sm:$0xf]  ;;  %v183_v19 = vld [vmem:[#allocation5 + $0x4] sm:$0xf0] }
  0x10   :  { %v163_v17 = vor.u32 %v184_v14, %v160_v15  ;;  %v182_v20 = vld [vmem:[#allocation5 + $0x4] sm:$0xf]  ;;  %v152_v21 = vld [vmem:[#allocation5 + $0x8] sm:$0xf0]  ;;  %v151_v22 = vor.u32 %v183_v19, %v150_v18  ;;  %v43_v23 = vld [vmem:[#allocation2] sm:$0x3] }
  0x11   :  { %v155_v24 = vor.u32 %v182_v20, %v152_v21  ;;  %v44_v25 = vpack.c.bf16 %v43_v23, %v43_v23  ;;  %vm93_vm0 = vcmask 523264   ;;  %s277_s0 = smov [#allocation7]   ;;  %s137_s23 = sshll.u32 %s304_s2, 4  ;;  %vm126_vm1 = vcmask 1041408   ;;  %s138_s23 = int_to_ptr.hbm [resolvable:$true] %s137_s23 }
  0x12   :  { %102 = vmatpush.bf16.msra.mxu0 %v167_v10  ;;  %s135_s1 = sshll.u32 %s277_s0, 4  ;;  %s136_s1 = int_to_ptr.vmem [resolvable:$true] %s135_s1 }
  0x13   :  { %115 = vmatpush.bf16.msra.mxu1 %v171_v11 }
  0x16   :  { %103 = vmatpush.bf16.msra.mxu0 %v159_v16 }
  0x17   :  { %116 = vmatpush.bf16.msra.mxu1 %v163_v17 }
  0x1a   :  { %104 = vmatpush.bf16.msra.mxu0 %v151_v22 }
  0x1b   :  { %117 = vmatpush.bf16.msra.mxu1 %v155_v24 }
  0x1d   :  { %180 = vmatmul.msk.bf16.vlgmr.msra.gmra.mxu0 %vm93_vm0, %v44_v25 }
  0x1e   :  { %181 = vmatmul.msk.bf16.vlgmr.msra.gmra.mxu1 %vm93_vm0, %v44_v25 }
  0x9a   :  { %v106_v26 = vpop.f32.mrf.mxu0 }
  0x9b   :  { %v119_v27 = vpop.f32.mrf.mxu1 }
  0x9c   :  { %v125_v28 = vrot.slane %v119_v27, 6 }
  0x9e   :  { %v127_v29 = vsel %vm126_vm1, %v106_v26, %v125_v28 }
  0x9f   :  { %129 = vst [vmem:[#allocation7] sm:$0xf] %v127_v29 }
  0xa0   :  { %140 = dma.vmem_to_hbm [thread:$0]  %s136_s1, 64, %s138_s23, [#allocation4]  }
  0xa2   :  { %v108_v30 = vpop.f32.mrf.mxu0 }
  0xa3   :  { %v121_v31 = vpop.f32.mrf.mxu1 }
  0xa4   :  { %271 = dma.done.wait [#allocation4], 64  }
  0xa5   :  { %272 = vsyncadd [#allocation4], 4294967232 }
  0xa6   :  { %145 = vsyncpa [#allocation3], 1 }
  0xa7   :  { %146 = vsyncpa [#allocation6], 1 }
  0xa8   :  { %147 = vsyncpa [#allocation4], 1 }

</bundles_post_ra>
